<compile_context>
chip_gen: v5e
topology: v5e:2x2
jax: 0.10.0
libtpu: 0.0.40
codegen_flags: <defaults>
</compile_context>

<pallas_src>
import jax
import jax.numpy as jnp
from jax.experimental import pallas as pl
from jax.experimental.pallas import tpu as pltpu

LANE = 128      # TPU lane width (last dim)
SUBLANE = 8     # f32 sublane count (second-to-last dim)


def _round_up(n, m):
    return ((n + m - 1) // m) * m


def agi_hybrid_kernel(x_ref, w_ref, gate_ref, conn_ref, out_ref):
    """One batch tile per grid step.

    x_ref    : (M, TB, Hp)  module-major input activations        (VMEM)
    w_ref    : (M, Hp, Hp)  per-module linear weights             (VMEM)
    gate_ref : (M, Hp)      neurosymbolic gating weights          (VMEM)
    conn_ref : (M, M)       module-connection mixing matrix       (SMEM scalars)
    out_ref  : (TB, Hp)     integrated output, lane-dense         (VMEM)
    """
    M = x_ref.shape[0]                       # static, tiny (e.g. 4)

    # --- CognitiveArchitecture.process ---
    # Per-module linear on the MXU: y_m = x_m @ w_m  (f32 in, f32 accumulate).
    # M is tiny & fixed -> statically unrolled so the LLO scheduler can
    # interleave the matmuls with the VPU / EUP work below.
    ys = []
    for m in range(M):
        xm = x_ref[m]                                            # (TB, Hp) f32
        wm = w_ref[m]                                            # (Hp, Hp) f32
        ys.append(jnp.dot(xm, wm, preferred_element_type=jnp.float32))

    # Connection mixing across modules (scalar conn weights from SMEM) + ReLU.
    mixed = []
    for n in range(M):
        acc = ys[0] * conn_ref[n, 0]
        for m in range(1, M):
            acc = acc + ys[m] * conn_ref[n, m]
        mixed.append(jnp.maximum(acc, 0.0))                      # (TB, Hp) f32

    # --- NeurosymbolicAI.integrate ---
    # Per-module gate logits + numerically stable softmax over the module axis.
    gate = gate_ref[...]                                         # (M, Hp) f32
    logits = [
        jnp.sum(mixed[m] * gate[m:m + 1, :], axis=-1, keepdims=True)  # (TB, 1)
        for m in range(M)
    ]
    m_max = logits[0]
    for m in range(1, M):
        m_max = jnp.maximum(m_max, logits[m])
    es = [jnp.exp(l - m_max) for l in logits]                    # EUP exp
    denom = es[0]
    for m in range(1, M):
        denom = denom + es[m]
    inv = 1.0 / denom                                            # (TB, 1), tiny

    # Gated reduction over modules (VPU multiply-add; no transpose, no 1-row dot).
    out = (es[0] * inv) * mixed[0]
    for m in range(1, M):
        out = out + (es[m] * inv) * mixed[m]                     # (TB, Hp)

    out_ref[...] = out.astype(out_ref.dtype)


def agi_hybrid_forward(x, w, conn, gate, *, batch_tile=256):
    """x: (B, M, H) f32, w: (M, H, H), conn: (M, M), gate: (M, H) -> (B, H) f32."""
    B, M, H = x.shape
    assert w.shape == (M, H, H)
    assert gate.shape == (M, H)
    # TODO(synk): the PyTorch spec declares conn as (num_modules, num_connections);
    # the realized mixing assumes a square module graph.
    assert conn.shape == (M, M), "module-connection matrix must be square (M, M)"

    # Lane-dense hidden axis: zero-pad H to a multiple of 128 (exact semantics:
    # padded lanes stay zero through the whole pipeline and are sliced off).
    Hp = _round_up(H, LANE)
    if Hp != H:
        x = jnp.pad(x, ((0, 0), (0, 0), (0, Hp - H)))
        w = jnp.pad(w, ((0, 0), (0, Hp - H), (0, Hp - H)))
        gate = jnp.pad(gate, ((0, 0), (0, Hp - H)))

    # Batch tiling: TB rows per grid step so every module matmul feeds the MXU
    # with a (TB, Hp) LHS instead of a single row.  Padded batch rows are all
    # zero and are sliced off at the end.
    TB = min(batch_tile, _round_up(B, SUBLANE))
    Bp = _round_up(B, TB)
    if Bp != B:
        x = jnp.pad(x, ((0, Bp - B), (0, 0), (0, 0)))

    # Module-major layout (M, Bp, Hp): each per-module slab is a contiguous,
    # vreg-aligned (TB, Hp) tile inside the kernel (no sublane gather).
    x_mbh = jnp.transpose(x, (1, 0, 2))

    grid = (Bp // TB,)
    out = pl.pallas_call(
        agi_hybrid_kernel,
        out_shape=jax.ShapeDtypeStruct((Bp, Hp), jnp.float32),
        grid=grid,
        in_specs=[
            pl.BlockSpec((M, TB, Hp), lambda b: (0, b, 0)),        # x, module-major
            # w / gate are grid-invariant; at these sizes double-buffering them
            # costs negligible VMEM.  If (M, H, H) is scaled up, add a K-tiled
            # "arbitrary" grid axis with a VMEM f32 accumulator instead.
            pl.BlockSpec((M, Hp, Hp), lambda b: (0, 0, 0)),        # w
            pl.BlockSpec((M, Hp), lambda b: (0, 0)),               # gate
            pl.BlockSpec(memory_space=pltpu.MemorySpace.SMEM),     # conn scalars
        ],
        out_specs=pl.BlockSpec((TB, Hp), lambda b: (b, 0)),
        compiler_params=pltpu.CompilerParams(
            dimension_semantics=("parallel",),      # shards batch tiles on v7x
            vmem_limit_bytes=64 * 1024 * 1024,
        ),
    )(x_mbh, w, gate, conn)
    return out[:B, :H]


def reference_forward(x, w, conn, gate):
    """Pure-JAX reference of the same arithmetic (f32 throughout)."""
    y = jnp.einsum("bmh,mhk->bmk", x, w, preferred_element_type=jnp.float32)
    mixed = jnp.maximum(jnp.einsum("nm,bmh->bnh", conn, y), 0.0)
    logits = jnp.sum(mixed * gate[None], axis=-1)                 # (B, M)
    alpha = jax.nn.softmax(logits, axis=-1)                       # (B, M)
    return jnp.einsum("bm,bmh->bh", alpha, mixed)


def _run_case(key, batch, num_modules, hidden, batch_tile):
    k_x, k_w, k_c, k_g = jax.random.split(key, 4)
    x = jax.random.normal(k_x, (batch, num_modules, hidden), dtype=jnp.float32)
    w = jax.random.normal(k_w, (num_modules, hidden, hidden), dtype=jnp.float32) * 0.1
    conn = jax.random.normal(k_c, (num_modules, num_modules), dtype=jnp.float32) * 0.5
    gate = jax.random.normal(k_g, (num_modules, hidden), dtype=jnp.float32) * 0.1

    out = agi_hybrid_forward(x, w, conn, gate, batch_tile=batch_tile)
    out = jax.block_until_ready(out)

    ref = reference_forward(x, w, conn, gate)
    assert out.shape == (batch, hidden)
    assert jnp.allclose(out, ref, atol=1e-3, rtol=1e-3), "mismatch vs reference"


if __name__ == "__main__":
    key = jax.random.PRNGKey(0)
    k1, k2 = jax.random.split(key)

    # small, module-consistent shapes (num_modules == num_connections == 4)
    _run_case(k1, batch=2, num_modules=4, hidden=32, batch_tile=256)   # padding path
    _run_case(k2, batch=20, num_modules=4, hidden=128, batch_tile=8)   # multi-tile grid

    print("KERNEL_OK")
</pallas_src>

<mosaic_0001>
module attributes {stable_mosaic.version = 11 : i64} {
  func.func @agi_hybrid_kernel(%arg0: i32, %arg1: memref<4x8x128xf32, #tpu.memory_space<vmem>>, %arg2: memref<4x128x128xf32, #tpu.memory_space<vmem>>, %arg3: memref<4x128xf32, #tpu.memory_space<vmem>>, %arg4: memref<4x4xf32, #tpu.memory_space<smem>>, %arg5: memref<8x128xf32, #tpu.memory_space<vmem>>) attributes {dimension_semantics = [#tpu.dimension_semantics<parallel>], iteration_bounds = array<i64: 1>, scalar_prefetch = 0 : i64, scratch_operands = 0 : i64, tpu.core_type = #tpu.core_type<tc>, window_params = [{transform_indices = @transform_0, window_bounds = array<i64: 4, 8, 128>}, {pipeline_mode = #tpu.pipeline_mode<synchronous>, transform_indices = @transform_1, window_bounds = array<i64: 4, 128, 128>}, {pipeline_mode = #tpu.pipeline_mode<synchronous>, transform_indices = @transform_2, window_bounds = array<i64: 4, 128>}, {transform_indices = @transform_3, window_bounds = array<i64: 4, 4>}, {transform_indices = @transform_4, window_bounds = array<i64: 8, 128>}]} {
    %c0 = arith.constant 0 : index
    %c0_0 = arith.constant 0 : index
    %c0_1 = arith.constant 0 : index
    %0 = vector.load %arg1[%c0, %c0_0, %c0_1] : memref<4x8x128xf32, #tpu.memory_space<vmem>>, vector<1x8x128xf32>
    %1 = vector.shape_cast %0 : vector<1x8x128xf32> to vector<8x128xf32>
    %c0_2 = arith.constant 0 : index
    %c0_3 = arith.constant 0 : index
    %c0_4 = arith.constant 0 : index
    %2 = vector.load %arg2[%c0_2, %c0_3, %c0_4] : memref<4x128x128xf32, #tpu.memory_space<vmem>>, vector<1x128x128xf32>
    %3 = vector.shape_cast %2 : vector<1x128x128xf32> to vector<128x128xf32>
    %cst = arith.constant dense<0.000000e+00> : vector<8x128xf32>
    %4 = tpu.matmul %1, %3, %cst {dimension_numbers = #tpu.dot_dimension_numbers<[1], [0], [0], [1], [0, 0, 1, 1], [], []>} : vector<8x128xf32>, vector<128x128xf32>, vector<8x128xf32> -> vector<8x128xf32>
    %c1 = arith.constant 1 : index
    %c0_5 = arith.constant 0 : index
    %c0_6 = arith.constant 0 : index
    %5 = vector.load %arg1[%c1, %c0_5, %c0_6] : memref<4x8x128xf32, #tpu.memory_space<vmem>>, vector<1x8x128xf32>
    %6 = vector.shape_cast %5 : vector<1x8x128xf32> to vector<8x128xf32>
    %c1_7 = arith.constant 1 : index
    %c0_8 = arith.constant 0 : index
    %c0_9 = arith.constant 0 : index
    %7 = vector.load %arg2[%c1_7, %c0_8, %c0_9] : memref<4x128x128xf32, #tpu.memory_space<vmem>>, vector<1x128x128xf32>
    %8 = vector.shape_cast %7 : vector<1x128x128xf32> to vector<128x128xf32>
    %cst_10 = arith.constant dense<0.000000e+00> : vector<8x128xf32>
    %9 = tpu.matmul %6, %8, %cst_10 {dimension_numbers = #tpu.dot_dimension_numbers<[1], [0], [0], [1], [0, 0, 1, 1], [], []>} : vector<8x128xf32>, vector<128x128xf32>, vector<8x128xf32> -> vector<8x128xf32>
    %c2 = arith.constant 2 : index
    %c0_11 = arith.constant 0 : index
    %c0_12 = arith.constant 0 : index
    %10 = vector.load %arg1[%c2, %c0_11, %c0_12] : memref<4x8x128xf32, #tpu.memory_space<vmem>>, vector<1x8x128xf32>
    %11 = vector.shape_cast %10 : vector<1x8x128xf32> to vector<8x128xf32>
    %c2_13 = arith.constant 2 : index
    %c0_14 = arith.constant 0 : index
    %c0_15 = arith.constant 0 : index
    %12 = vector.load %arg2[%c2_13, %c0_14, %c0_15] : memref<4x128x128xf32, #tpu.memory_space<vmem>>, vector<1x128x128xf32>
    %13 = vector.shape_cast %12 : vector<1x128x128xf32> to vector<128x128xf32>
    %cst_16 = arith.constant dense<0.000000e+00> : vector<8x128xf32>
    %14 = tpu.matmul %11, %13, %cst_16 {dimension_numbers = #tpu.dot_dimension_numbers<[1], [0], [0], [1], [0, 0, 1, 1], [], []>} : vector<8x128xf32>, vector<128x128xf32>, vector<8x128xf32> -> vector<8x128xf32>
    %c3 = arith.constant 3 : index
    %c0_17 = arith.constant 0 : index
    %c0_18 = arith.constant 0 : index
    %15 = vector.load %arg1[%c3, %c0_17, %c0_18] : memref<4x8x128xf32, #tpu.memory_space<vmem>>, vector<1x8x128xf32>
    %16 = vector.shape_cast %15 : vector<1x8x128xf32> to vector<8x128xf32>
    %c3_19 = arith.constant 3 : index
    %c0_20 = arith.constant 0 : index
    %c0_21 = arith.constant 0 : index
    %17 = vector.load %arg2[%c3_19, %c0_20, %c0_21] : memref<4x128x128xf32, #tpu.memory_space<vmem>>, vector<1x128x128xf32>
    %18 = vector.shape_cast %17 : vector<1x128x128xf32> to vector<128x128xf32>
    %cst_22 = arith.constant dense<0.000000e+00> : vector<8x128xf32>
    %19 = tpu.matmul %16, %18, %cst_22 {dimension_numbers = #tpu.dot_dimension_numbers<[1], [0], [0], [1], [0, 0, 1, 1], [], []>} : vector<8x128xf32>, vector<128x128xf32>, vector<8x128xf32> -> vector<8x128xf32>
    %c0_23 = arith.constant 0 : index
    %c0_24 = arith.constant 0 : index
    %20 = memref.load %arg4[%c0_23, %c0_24] : memref<4x4xf32, #tpu.memory_space<smem>>
    %21 = vector.broadcast %20 : f32 to vector<8x128xf32>
    %22 = arith.mulf %4, %21 : vector<8x128xf32>
    %c0_25 = arith.constant 0 : index
    %c1_26 = arith.constant 1 : index
    %23 = memref.load %arg4[%c0_25, %c1_26] : memref<4x4xf32, #tpu.memory_space<smem>>
    %24 = vector.broadcast %23 : f32 to vector<8x128xf32>
    %25 = arith.mulf %9, %24 : vector<8x128xf32>
    %26 = arith.addf %22, %25 : vector<8x128xf32>
    %c0_27 = arith.constant 0 : index
    %c2_28 = arith.constant 2 : index
    %27 = memref.load %arg4[%c0_27, %c2_28] : memref<4x4xf32, #tpu.memory_space<smem>>
    %28 = vector.broadcast %27 : f32 to vector<8x128xf32>
    %29 = arith.mulf %14, %28 : vector<8x128xf32>
    %30 = arith.addf %26, %29 : vector<8x128xf32>
    %c0_29 = arith.constant 0 : index
    %c3_30 = arith.constant 3 : index
    %31 = memref.load %arg4[%c0_29, %c3_30] : memref<4x4xf32, #tpu.memory_space<smem>>
    %32 = vector.broadcast %31 : f32 to vector<8x128xf32>
    %33 = arith.mulf %19, %32 : vector<8x128xf32>
    %34 = arith.addf %30, %33 : vector<8x128xf32>
    %cst_31 = arith.constant 0.000000e+00 : f32
    %35 = vector.broadcast %cst_31 : f32 to vector<8x128xf32>
    %36 = arith.maximumf %34, %35 : vector<8x128xf32>
    %c1_32 = arith.constant 1 : index
    %c0_33 = arith.constant 0 : index
    %37 = memref.load %arg4[%c1_32, %c0_33] : memref<4x4xf32, #tpu.memory_space<smem>>
    %38 = vector.broadcast %37 : f32 to vector<8x128xf32>
    %39 = arith.mulf %4, %38 : vector<8x128xf32>
    %c1_34 = arith.constant 1 : index
    %c1_35 = arith.constant 1 : index
    %40 = memref.load %arg4[%c1_34, %c1_35] : memref<4x4xf32, #tpu.memory_space<smem>>
    %41 = vector.broadcast %40 : f32 to vector<8x128xf32>
    %42 = arith.mulf %9, %41 : vector<8x128xf32>
    %43 = arith.addf %39, %42 : vector<8x128xf32>
    %c1_36 = arith.constant 1 : index
    %c2_37 = arith.constant 2 : index
    %44 = memref.load %arg4[%c1_36, %c2_37] : memref<4x4xf32, #tpu.memory_space<smem>>
    %45 = vector.broadcast %44 : f32 to vector<8x128xf32>
    %46 = arith.mulf %14, %45 : vector<8x128xf32>
    %47 = arith.addf %43, %46 : vector<8x128xf32>
    %c1_38 = arith.constant 1 : index
    %c3_39 = arith.constant 3 : index
    %48 = memref.load %arg4[%c1_38, %c3_39] : memref<4x4xf32, #tpu.memory_space<smem>>
    %49 = vector.broadcast %48 : f32 to vector<8x128xf32>
    %50 = arith.mulf %19, %49 : vector<8x128xf32>
    %51 = arith.addf %47, %50 : vector<8x128xf32>
    %cst_40 = arith.constant 0.000000e+00 : f32
    %52 = vector.broadcast %cst_40 : f32 to vector<8x128xf32>
    %53 = arith.maximumf %51, %52 : vector<8x128xf32>
    %c2_41 = arith.constant 2 : index
    %c0_42 = arith.constant 0 : index
    %54 = memref.load %arg4[%c2_41, %c0_42] : memref<4x4xf32, #tpu.memory_space<smem>>
    %55 = vector.broadcast %54 : f32 to vector<8x128xf32>
    %56 = arith.mulf %4, %55 : vector<8x128xf32>
    %c2_43 = arith.constant 2 : index
    %c1_44 = arith.constant 1 : index
    %57 = memref.load %arg4[%c2_43, %c1_44] : memref<4x4xf32, #tpu.memory_space<smem>>
    %58 = vector.broadcast %57 : f32 to vector<8x128xf32>
    %59 = arith.mulf %9, %58 : vector<8x128xf32>
    %60 = arith.addf %56, %59 : vector<8x128xf32>
    %c2_45 = arith.constant 2 : index
    %c2_46 = arith.constant 2 : index
    %61 = memref.load %arg4[%c2_45, %c2_46] : memref<4x4xf32, #tpu.memory_space<smem>>
    %62 = vector.broadcast %61 : f32 to vector<8x128xf32>
    %63 = arith.mulf %14, %62 : vector<8x128xf32>
    %64 = arith.addf %60, %63 : vector<8x128xf32>
    %c2_47 = arith.constant 2 : index
    %c3_48 = arith.constant 3 : index
    %65 = memref.load %arg4[%c2_47, %c3_48] : memref<4x4xf32, #tpu.memory_space<smem>>
    %66 = vector.broadcast %65 : f32 to vector<8x128xf32>
    %67 = arith.mulf %19, %66 : vector<8x128xf32>
    %68 = arith.addf %64, %67 : vector<8x128xf32>
    %cst_49 = arith.constant 0.000000e+00 : f32
    %69 = vector.broadcast %cst_49 : f32 to vector<8x128xf32>
    %70 = arith.maximumf %68, %69 : vector<8x128xf32>
    %c3_50 = arith.constant 3 : index
    %c0_51 = arith.constant 0 : index
    %71 = memref.load %arg4[%c3_50, %c0_51] : memref<4x4xf32, #tpu.memory_space<smem>>
    %72 = vector.broadcast %71 : f32 to vector<8x128xf32>
    %73 = arith.mulf %4, %72 : vector<8x128xf32>
    %c3_52 = arith.constant 3 : index
    %c1_53 = arith.constant 1 : index
    %74 = memref.load %arg4[%c3_52, %c1_53] : memref<4x4xf32, #tpu.memory_space<smem>>
    %75 = vector.broadcast %74 : f32 to vector<8x128xf32>
    %76 = arith.mulf %9, %75 : vector<8x128xf32>
    %77 = arith.addf %73, %76 : vector<8x128xf32>
    %c3_54 = arith.constant 3 : index
    %c2_55 = arith.constant 2 : index
    %78 = memref.load %arg4[%c3_54, %c2_55] : memref<4x4xf32, #tpu.memory_space<smem>>
    %79 = vector.broadcast %78 : f32 to vector<8x128xf32>
    %80 = arith.mulf %14, %79 : vector<8x128xf32>
    %81 = arith.addf %77, %80 : vector<8x128xf32>
    %c3_56 = arith.constant 3 : index
    %c3_57 = arith.constant 3 : index
    %82 = memref.load %arg4[%c3_56, %c3_57] : memref<4x4xf32, #tpu.memory_space<smem>>
    %83 = vector.broadcast %82 : f32 to vector<8x128xf32>
    %84 = arith.mulf %19, %83 : vector<8x128xf32>
    %85 = arith.addf %81, %84 : vector<8x128xf32>
    %cst_58 = arith.constant 0.000000e+00 : f32
    %86 = vector.broadcast %cst_58 : f32 to vector<8x128xf32>
    %87 = arith.maximumf %85, %86 : vector<8x128xf32>
    %c0_59 = arith.constant 0 : index
    %c0_60 = arith.constant 0 : index
    %88 = vector.load %arg3[%c0_59, %c0_60] : memref<4x128xf32, #tpu.memory_space<vmem>>, vector<4x128xf32>
    %89 = vector.extract_strided_slice %88 {offsets = [0, 0], sizes = [1, 128], strides = [1, 1]} : vector<4x128xf32> to vector<1x128xf32>
    %90 = vector.broadcast %89 : vector<1x128xf32> to vector<8x128xf32>
    %91 = arith.mulf %36, %90 : vector<8x128xf32>
    %cst_61 = arith.constant dense<0.000000e+00> : vector<8xf32>
    %92 = vector.multi_reduction <add>, %91, %cst_61 [1] : vector<8x128xf32> to vector<8xf32>
    %93 = vector.shape_cast %92 : vector<8xf32> to vector<8x1xf32>
    %94 = vector.extract_strided_slice %88 {offsets = [1, 0], sizes = [1, 128], strides = [1, 1]} : vector<4x128xf32> to vector<1x128xf32>
    %95 = vector.broadcast %94 : vector<1x128xf32> to vector<8x128xf32>
    %96 = arith.mulf %53, %95 : vector<8x128xf32>
    %cst_62 = arith.constant dense<0.000000e+00> : vector<8xf32>
    %97 = vector.multi_reduction <add>, %96, %cst_62 [1] : vector<8x128xf32> to vector<8xf32>
    %98 = vector.shape_cast %97 : vector<8xf32> to vector<8x1xf32>
    %99 = vector.extract_strided_slice %88 {offsets = [2, 0], sizes = [1, 128], strides = [1, 1]} : vector<4x128xf32> to vector<1x128xf32>
    %100 = vector.broadcast %99 : vector<1x128xf32> to vector<8x128xf32>
    %101 = arith.mulf %70, %100 : vector<8x128xf32>
    %cst_63 = arith.constant dense<0.000000e+00> : vector<8xf32>
    %102 = vector.multi_reduction <add>, %101, %cst_63 [1] : vector<8x128xf32> to vector<8xf32>
    %103 = vector.shape_cast %102 : vector<8xf32> to vector<8x1xf32>
    %104 = vector.extract_strided_slice %88 {offsets = [3, 0], sizes = [1, 128], strides = [1, 1]} : vector<4x128xf32> to vector<1x128xf32>
    %105 = vector.broadcast %104 : vector<1x128xf32> to vector<8x128xf32>
    %106 = arith.mulf %87, %105 : vector<8x128xf32>
    %cst_64 = arith.constant dense<0.000000e+00> : vector<8xf32>
    %107 = vector.multi_reduction <add>, %106, %cst_64 [1] : vector<8x128xf32> to vector<8xf32>
    %108 = vector.shape_cast %107 : vector<8xf32> to vector<8x1xf32>
    %109 = arith.maximumf %93, %98 : vector<8x1xf32>
    %110 = arith.maximumf %109, %103 : vector<8x1xf32>
    %111 = arith.maximumf %110, %108 : vector<8x1xf32>
    %112 = arith.subf %93, %111 : vector<8x1xf32>
    %113 = math.exp %112 : vector<8x1xf32>
    %114 = arith.subf %98, %111 : vector<8x1xf32>
    %115 = math.exp %114 : vector<8x1xf32>
    %116 = arith.subf %103, %111 : vector<8x1xf32>
    %117 = math.exp %116 : vector<8x1xf32>
    %118 = arith.subf %108, %111 : vector<8x1xf32>
    %119 = math.exp %118 : vector<8x1xf32>
    %120 = arith.addf %113, %115 : vector<8x1xf32>
    %121 = arith.addf %120, %117 : vector<8x1xf32>
    %122 = arith.addf %121, %119 : vector<8x1xf32>
    %cst_65 = arith.constant 1.000000e+00 : f32
    %123 = vector.broadcast %cst_65 : f32 to vector<8x1xf32>
    %124 = arith.divf %123, %122 : vector<8x1xf32>
    %125 = arith.mulf %113, %124 : vector<8x1xf32>
    %126 = vector.broadcast %125 : vector<8x1xf32> to vector<8x128xf32>
    %127 = arith.mulf %126, %36 : vector<8x128xf32>
    %128 = arith.mulf %115, %124 : vector<8x1xf32>
    %129 = vector.broadcast %128 : vector<8x1xf32> to vector<8x128xf32>
    %130 = arith.mulf %129, %53 : vector<8x128xf32>
    %131 = arith.addf %127, %130 : vector<8x128xf32>
    %132 = arith.mulf %117, %124 : vector<8x1xf32>
    %133 = vector.broadcast %132 : vector<8x1xf32> to vector<8x128xf32>
    %134 = arith.mulf %133, %70 : vector<8x128xf32>
    %135 = arith.addf %131, %134 : vector<8x128xf32>
    %136 = arith.mulf %119, %124 : vector<8x1xf32>
    %137 = vector.broadcast %136 : vector<8x1xf32> to vector<8x128xf32>
    %138 = arith.mulf %137, %87 : vector<8x128xf32>
    %139 = arith.addf %135, %138 : vector<8x128xf32>
    %c0_66 = arith.constant 0 : index
    %c0_67 = arith.constant 0 : index
    %140 = vector.load %arg5[%c0_66, %c0_67] : memref<8x128xf32, #tpu.memory_space<vmem>>, vector<8x128xf32>
    tpu.vector_store %arg5[%c0_66, %c0_67], %139 {strides = array<i32>} : memref<8x128xf32, #tpu.memory_space<vmem>>, vector<8x128xf32>,
    return
  }
  func.func @transform_0(%arg0: i32) -> (i32, i32, i32) {
    %c0_i32 = arith.constant 0 : i32
    %c0_i32_0 = arith.constant 0 : i32
    %c0_i32_1 = arith.constant 0 : i32
    return %c0_i32, %arg0, %c0_i32_0 : i32, i32, i32
  }
  func.func @transform_1(%arg0: i32) -> (i32, i32, i32) {
    %c0_i32 = arith.constant 0 : i32
    %c0_i32_0 = arith.constant 0 : i32
    %c0_i32_1 = arith.constant 0 : i32
    %c0_i32_2 = arith.constant 0 : i32
    return %c0_i32, %c0_i32_0, %c0_i32_1 : i32, i32, i32
  }
  func.func @transform_2(%arg0: i32) -> (i32, i32) {
    %c0_i32 = arith.constant 0 : i32
    %c0_i32_0 = arith.constant 0 : i32
    %c0_i32_1 = arith.constant 0 : i32
    return %c0_i32, %c0_i32_0 : i32, i32
  }
  func.func @transform_3(%arg0: i32) -> (i32, i32) {
    %c0_i32 = arith.constant 0 : i32
    %c0_i32_0 = arith.constant 0 : i32
    %c0_i32_1 = arith.constant 0 : i32
    return %c0_i32, %c0_i32_0 : i32, i32
  }
  func.func @transform_4(%arg0: i32) -> (i32, i32) {
    %c0_i32 = arith.constant 0 : i32
    %c0_i32_0 = arith.constant 0 : i32
    return %arg0, %c0_i32 : i32, i32
  }
}

</mosaic_0001>

<bundles_post_ra>
// kernel: tpu_custom_call.1
= control target key start
LH: loop header
LB: loop body
LE: loop exit
PB: predicated region body
PF: predicated region fallthrough
CT: control target
= control target key end

     0   :  { %9 = vsyncpa [#allocation3], 0  ;;  %s607_s0 = inlined_call_operand.hbm [shape: f32[4,8,128], index: 0, kind: input, shape index: {}]   ;;  %s608_s1 = inlined_call_operand.hbm [shape: f32[4,128,128], index: 1, kind: input, shape index: {}]   ;;  %s609_s2 = inlined_call_operand.hbm [shape: f32[4,128], index: 2, kind: input, shape index: {}]   ;;  %s610_s3 = inlined_call_operand.hbm [shape: f32[4,4], index: 3, kind: input, shape index: {}]   ;;  %s611_s4 = inlined_call_operand.hbm [shape: f32[8,128], index: 4, kind: output, shape index: {}]  }
   0x1   :  { %10 = vsyncpa [#allocation7], 0 }
   0x2   :  { %11 = vsyncpa [#allocation5], 0 }
   0x3   :  { %12 = vsyncpa [#allocation4], 0  ;;  %s30_s17 = sshll.u32 %s608_s1, 4  ;;  %s523_s18 = smov [#allocation6]   ;;  %s31_s17 = int_to_ptr.hbm [resolvable:$true] %s30_s17 }
   0x4   :  { %s32_s19 = sshll.u32 %s523_s18, 4  ;;  %s17_s22 = sshll.u32 %s607_s0, 4  ;;  %s33_s19 = int_to_ptr.vmem [resolvable:$true] %s32_s19  ;;  %s18_s22 = int_to_ptr.hbm [resolvable:$true] %s17_s22 }
   0x5   :  { %s524_s23 = smov 128   ;;  %s525_s24 = smov 8  }
   0x6   :  { %38 = dma.hbm_to_vmem [thread:$0]  %s31_s17, 8192, %s33_s19, [#allocation7], %s524_s23, %s524_s23, %s525_s24  }
   0x7   :  { %s526_s25 = smov [#allocation2]   ;;  %s44_s29 = sshll.u32 %s609_s2, 4  ;;  %s45_s29 = int_to_ptr.hbm [resolvable:$true] %s44_s29 }
   0x8   :  { %s19_s26 = sshll.u32 %s526_s25, 4  ;;  %s55_s5 = sshll.u32 %s610_s3, 4  ;;  %s20_s26 = int_to_ptr.vmem [resolvable:$true] %s19_s26  ;;  %s56_s5 = int_to_ptr.hbm [resolvable:$true] %s55_s5 }
   0x9   :  { %25 = dma.hbm_to_vmem [thread:$0]  %s18_s22, 512, %s20_s26, [#allocation3], %s524_s23, %s524_s23, %s525_s24  }
   0xa   :  { %s527_s6 = smov [#allocation8]   ;;  %s528_s0 = smov [#allocation9]  }
   0xb   :  { %s46_s7 = sshll.u32 %s527_s6, 4  ;;  %s47_s7 = int_to_ptr.vmem [resolvable:$true] %s46_s7 }
   0xc   :  { %49 = dma.hbm_to_vmem [thread:$0]  %s45_s29, 64, %s47_s7, [#allocation7]  }
   0xd   :  { %58 = dma.hbm_to_smem %s56_s5, 64, %s528_s0, [#allocation5]  }
   0xe   :  { %515 = dma.done.wait [#allocation3], 512  }
   0xf   :  { %516 = vsyncadd [#allocation3], 4294966784 }
  0x10   :  { %517 = dma.done.wait [#allocation7], 8256  }
  0x11   :  { %518 = vsyncadd [#allocation7], 4294959040 }
  0x12   :  { %519 = dma.done.wait [#allocation5], 64  }
  0x13   :  { %520 = vsyncadd [#allocation5], 4294967232 }
  0x14   :  { %75 = sfence }
  0x15   :  { %v170_v0 = vld [vmem:[#allocation6 + $0x178] sm:$0xff]  ;;  %v169_v1 = vld [vmem:[#allocation6 + $0x170] sm:$0xff]  ;;  %v168_v5 = vld [vmem:[#allocation6 + $0x168] sm:$0xff]  ;;  %s567_s2 = sld [smem:[#allocation9]]  ;;  %s529_s22 = smov [#allocation10]  }
  0x16   :  { %v209_v2 = vld [vmem:[#allocation6 + $0x1f8] sm:$0xff]  ;;  %171 = vmatpush.msra.mxu2 %v170_v0  ;;  %v208_v6 = vld [vmem:[#allocation6 + $0x1f0] sm:$0xff]  ;;  %v207_v9 = vld [vmem:[#allocation6 + $0x1e8] sm:$0xff]  ;;  %s378_s3 = sld [smem:[#allocation9 + $0x80]]  ;;  %s361_s23 = sshll.u32 %s529_s22, 4  ;;  %s362_s23 = int_to_ptr.vmem [resolvable:$true] %s361_s23 }
  0x17   :  { %210 = vmatpush.msra.mxu3 %v209_v2  ;;  %v92_v3 = vld [vmem:[#allocation6 + $0x78] sm:$0xff]  ;;  %v91_v7 = vld [vmem:[#allocation6 + $0x70] sm:$0xff]  ;;  %v90_v10 = vld [vmem:[#allocation6 + $0x68] sm:$0xff]  ;;  %s382_s8 = sld [smem:[#allocation9 + $0x100]]  ;;  %s363_s26 = sshll.u32 %s611_s4, 4  ;;  %s364_s26 = int_to_ptr.hbm [resolvable:$true] %s363_s26 }
  0x18   :  { %v131_v4 = vld [vmem:[#allocation6 + $0xf8] sm:$0xff]  ;;  %93 = vmatpush.msra.mxu0 %v92_v3  ;;  %v130_v8 = vld [vmem:[#allocation6 + $0xf0] sm:$0xff]  ;;  %172 = vmatpush.msra.mxu2 %v169_v1  ;;  %v167_v11 = vld [vmem:[#allocation6 + $0x160] sm:$0xff]  ;;  %s386_s9 = sld [smem:[#allocation9 + $0x180]] }
  0x19   :  { %132 = vmatpush.msra.mxu1 %v131_v4  ;;  %211 = vmatpush.msra.mxu3 %v208_v6  ;;  %v129_v12 = vld [vmem:[#allocation6 + $0xe8] sm:$0xff]  ;;  %v206_v13 = vld [vmem:[#allocation6 + $0x1e0] sm:$0xff]  ;;  %v166_v16 = vld [vmem:[#allocation6 + $0x158] sm:$0xff]  ;;  %s375_s10 = sld [smem:[#allocation9 + $0x1]] }
  0x1a   :  { %94 = vmatpush.msra.mxu0 %v91_v7  ;;  %173 = vmatpush.msra.mxu2 %v168_v5  ;;  %v89_v14 = vld [vmem:[#allocation6 + $0x60] sm:$0xff]  ;;  %v205_v17 = vld [vmem:[#allocation6 + $0x1d8] sm:$0xff]  ;;  %v165_v20 = vld [vmem:[#allocation6 + $0x150] sm:$0xff]  ;;  %s379_s11 = sld [smem:[#allocation9 + $0x81]] }
  0x1b   :  { %133 = vmatpush.msra.mxu1 %v130_v8  ;;  %212 = vmatpush.msra.mxu3 %v207_v9  ;;  %v128_v15 = vld [vmem:[#allocation6 + $0xe0] sm:$0xff]  ;;  %v88_v18 = vld [vmem:[#allocation6 + $0x58] sm:$0xff]  ;;  %v204_v21 = vld [vmem:[#allocation6 + $0x1d0] sm:$0xff]  ;;  %s383_s12 = sld [smem:[#allocation9 + $0x101]]  ;;  %v231_v4 = vstv %s567_s2 }
  0x1c   :  { %95 = vmatpush.msra.mxu0 %v90_v10  ;;  %174 = vmatpush.msra.mxu2 %v167_v11  ;;  %v127_v19 = vld [vmem:[#allocation6 + $0xd8] sm:$0xff]  ;;  %v87_v22 = vld [vmem:[#allocation6 + $0x50] sm:$0xff]  ;;  %v164_v24 = vld [vmem:[#allocation6 + $0x148] sm:$0xff]  ;;  %s387_s13 = sld [smem:[#allocation9 + $0x181]]  ;;  %v247_v5 = vstv %s378_s3 }
  0x1d   :  { %134 = vmatpush.msra.mxu1 %v129_v12  ;;  %213 = vmatpush.msra.mxu3 %v206_v13  ;;  %v126_v23 = vld [vmem:[#allocation6 + $0xd0] sm:$0xff]  ;;  %v203_v25 = vld [vmem:[#allocation6 + $0x1c8] sm:$0xff]  ;;  %v163_v28 = vld [vmem:[#allocation6 + $0x140] sm:$0xff]  ;;  %s569_s14 = sld [smem:[#allocation9 + $0x2]]  ;;  %v263_v6 = vstv %s382_s8 }
  0x1e   :  { %96 = vmatpush.msra.mxu0 %v89_v14  ;;  %175 = vmatpush.msra.mxu2 %v166_v16  ;;  %v86_v26 = vld [vmem:[#allocation6 + $0x48] sm:$0xff]  ;;  %v202_v29 = vld [vmem:[#allocation6 + $0x1c0] sm:$0xff]  ;;  %v162_v32 = vld [vmem:[#allocation6 + $0x138] sm:$0xff]  ;;  %s571_s15 = sld [smem:[#allocation9 + $0x82]]  ;;  %v279_v7 = vstv %s386_s9 }
  0x1f   :  { %135 = vmatpush.msra.mxu1 %v128_v15  ;;  %214 = vmatpush.msra.mxu3 %v205_v17  ;;  %v125_v27 = vld [vmem:[#allocation6 + $0xc8] sm:$0xff]  ;;  %v85_v30 = vld [vmem:[#allocation6 + $0x40] sm:$0xff]  ;;  %v201_v33 = vld [vmem:[#allocation6 + $0x1b8] sm:$0xff]  ;;  %s573_s16 = sld [smem:[#allocation9 + $0x102]]  ;;  %v234_v8 = vstv %s375_s10 }
  0x20   :  { %97 = vmatpush.msra.mxu0 %v88_v18  ;;  %176 = vmatpush.msra.mxu2 %v165_v20  ;;  %v124_v31 = vld [vmem:[#allocation6 + $0xc0] sm:$0xff]  ;;  %v84_v34 = vld [vmem:[#allocation6 + $0x38] sm:$0xff]  ;;  %v161_v36 = vld [vmem:[#allocation6 + $0x130] sm:$0xff]  ;;  %s575_s17 = sld [smem:[#allocation9 + $0x182]]  ;;  %v250_v9 = vstv %s379_s11 }
  0x21   :  { %136 = vmatpush.msra.mxu1 %v127_v19  ;;  %215 = vmatpush.msra.mxu3 %v204_v21  ;;  %v123_v35 = vld [vmem:[#allocation6 + $0xb8] sm:$0xff]  ;;  %v200_v37 = vld [vmem:[#allocation6 + $0x1b0] sm:$0xff]  ;;  %v160_v40 = vld [vmem:[#allocation6 + $0x128] sm:$0xff]  ;;  %s577_s18 = sld [smem:[#allocation9 + $0x3]]  ;;  %v266_v10 = vstv %s383_s12 }
  0x22   :  { %98 = vmatpush.msra.mxu0 %v87_v22  ;;  %177 = vmatpush.msra.mxu2 %v164_v24  ;;  %v83_v38 = vld [vmem:[#allocation6 + $0x30] sm:$0xff]  ;;  %v199_v41 = vld [vmem:[#allocation6 + $0x1a8] sm:$0xff]  ;;  %v159_v44 = vld [vmem:[#allocation6 + $0x120] sm:$0xff]  ;;  %s579_s19 = sld [smem:[#allocation9 + $0x83]]  ;;  %v282_v11 = vstv %s387_s13 }
  0x23   :  { %137 = vmatpush.msra.mxu1 %v126_v23  ;;  %216 = vmatpush.msra.mxu3 %v203_v25  ;;  %v122_v39 = vld [vmem:[#allocation6 + $0xb0] sm:$0xff]  ;;  %v82_v42 = vld [vmem:[#allocation6 + $0x28] sm:$0xff]  ;;  %v198_v45 = vld [vmem:[#allocation6 + $0x1a0] sm:$0xff]  ;;  %s581_s20 = sld [smem:[#allocation9 + $0x103]]  ;;  %v238_v14 = vstv %s569_s14 }
  0x24   :  { %99 = vmatpush.msra.mxu0 %v86_v26  ;;  %178 = vmatpush.msra.mxu2 %v163_v28  ;;  %v121_v43 = vld [vmem:[#allocation6 + $0xa8] sm:$0xff]  ;;  %v81_v46 = vld [vmem:[#allocation6 + $0x20] sm:$0xff]  ;;  %v158_v48 = vld [vmem:[#allocation6 + $0x118] sm:$0xff]  ;;  %s583_s21 = sld [smem:[#allocation9 + $0x183]]  ;;  %v254_v15 = vstv %s571_s15 }
  0x25   :  { %138 = vmatpush.msra.mxu1 %v125_v27  ;;  %217 = vmatpush.msra.mxu3 %v202_v29  ;;  %v120_v47 = vld [vmem:[#allocation6 + $0xa0] sm:$0xff]  ;;  %v197_v49 = vld [vmem:[#allocation6 + $0x198] sm:$0xff]  ;;  %v157_v52 = vld [vmem:[#allocation6 + $0x110] sm:$0xff]  ;;  %v270_v16 = vstv %s573_s16 }
  0x26   :  { %100 = vmatpush.msra.mxu0 %v85_v30  ;;  %179 = vmatpush.msra.mxu2 %v162_v32  ;;  %v80_v50 = vld [vmem:[#allocation6 + $0x18] sm:$0xff]  ;;  %v196_v53 = vld [vmem:[#allocation6 + $0x190] sm:$0xff]  ;;  %v156_v56 = vld [vmem:[#allocation6 + $0x108] sm:$0xff]  ;;  %v286_v17 = vstv %s575_s17 }
  0x27   :  { %139 = vmatpush.msra.mxu1 %v124_v31  ;;  %218 = vmatpush.msra.mxu3 %v201_v33  ;;  %v119_v51 = vld [vmem:[#allocation6 + $0x98] sm:$0xff]  ;;  %v79_v54 = vld [vmem:[#allocation6 + $0x10] sm:$0xff]  ;;  %v195_v57 = vld [vmem:[#allocation6 + $0x188] sm:$0xff]  ;;  %v242_v26 = vstv %s577_s18 }
  0x28   :  { %101 = vmatpush.msra.mxu0 %v84_v34  ;;  %180 = vmatpush.msra.mxu2 %v161_v36  ;;  %v118_v55 = vld [vmem:[#allocation6 + $0x90] sm:$0xff]  ;;  %v78_v58 = vld [vmem:[#allocation6 + $0x8] sm:$0xff]  ;;  %v155_v60 = vld [vmem:[#allocation6 + $0x100] sm:$0xff]  ;;  %v258_v27 = vstv %s579_s19 }
  0x29   :  { %140 = vmatpush.msra.mxu1 %v123_v35  ;;  %219 = vmatpush.msra.mxu3 %v200_v37  ;;  %v117_v59 = vld [vmem:[#allocation6 + $0x88] sm:$0xff]  ;;  %v194_v61 = vld [vmem:[#allocation6 + $0x180] sm:$0xff]  ;;  %v153_v62 = vld [vmem:[#allocation2 + $0x10] sm:$0xff]  ;;  %v274_v28 = vstv %s581_s20 }
  0x2a   :  { %102 = vmatpush.msra.mxu0 %v83_v38  ;;  %181 = vmatpush.msra.mxu2 %v160_v40  ;;  %v192_v63 = vld [vmem:[#allocation2 + $0x18] sm:$0xff]  ;;  %v77_v0 = vld [vmem:[#allocation6] sm:$0xff]  ;;  %v114_v3 = vld [vmem:[#allocation2 + $0x8] sm:$0xff]  ;;  %v290_v29 = vstv %s583_s21 }
  0x2b   :  { %141 = vmatpush.msra.mxu1 %v122_v39  ;;  %220 = vmatpush.msra.mxu3 %v199_v41  ;;  %v116_v1 = vld [vmem:[#allocation6 + $0x80] sm:$0xff] }
  0x2c   :  { %103 = vmatpush.msra.mxu0 %v82_v42  ;;  %182 = vmatpush.msra.mxu2 %v159_v44  ;;  %v76_v2 = vld [vmem:[#allocation2] sm:$0xff] }
  0x2d   :  { %142 = vmatpush.msra.mxu1 %v121_v43  ;;  %221 = vmatpush.msra.mxu3 %v198_v45  ;;  %v294_v40 = vld [vmem:[#allocation8] sm:$0xf] }
  0x2e   :  { %104 = vmatpush.msra.mxu0 %v81_v46  ;;  %183 = vmatpush.msra.mxu2 %v158_v48  ;;  %v295_v48 = vperm.slane %v294_v40, 0 }
  0x2f   :  { %143 = vmatpush.msra.mxu1 %v120_v47  ;;  %222 = vmatpush.msra.mxu3 %v197_v49  ;;  %v303_v47 = vperm.slane %v294_v40, 2 }
  0x30   :  { %105 = vmatpush.msra.mxu0 %v80_v50  ;;  %184 = vmatpush.msra.mxu2 %v157_v52 }
  0x31   :  { %144 = vmatpush.msra.mxu1 %v119_v51  ;;  %223 = vmatpush.msra.mxu3 %v196_v53 }
  0x32   :  { %106 = vmatpush.msra.mxu0 %v79_v54  ;;  %185 = vmatpush.msra.mxu2 %v156_v56 }
  0x33   :  { %145 = vmatpush.msra.mxu1 %v118_v55  ;;  %224 = vmatpush.msra.mxu3 %v195_v57 }
  0x34   :  { %107 = vmatpush.msra.mxu0 %v78_v58  ;;  %186 = vmatpush.msra.mxu2 %v155_v60  ;;  %v307_v60 = vperm.slane %v294_v40, 3 }
  0x35   :  { %146 = vmatpush.msra.mxu1 %v117_v59  ;;  %225 = vmatpush.msra.mxu3 %v194_v61 }
  0x36   :  { %187 = vmatmul.f32.vlgmr.msra.gmra.mxu2 %v153_v62  ;;  %226 = vmatmul.f32.vlgmr.msra.gmra.mxu3 %v192_v63  ;;  %v299_v62 = vperm.slane %v294_v40, 1 }
  0x37   :  { %108 = vmatpush.msra.mxu0 %v77_v0  ;;  %147 = vmatpush.msra.mxu1 %v116_v1 }
  0x38   :  { %109 = vmatmul.f32.vlgmr.msra.gmra.mxu0 %v76_v2  ;;  %148 = vmatmul.f32.vlgmr.msra.gmra.mxu1 %v114_v3 }
  0xb5   :  { %v110_v12 = vpop.f32.mrf.mxu0  ;;  %v149_v13 = vpop.f32.mrf.mxu1 }
  0xb6   :  { %v232_v18 = vmul.f32 %v231_v4, %v110_v12  ;;  %v248_v19 = vmul.f32 %v247_v5, %v110_v12  ;;  %v264_v20 = vmul.f32 %v263_v6, %v110_v12  ;;  %v280_v21 = vmul.f32 %v279_v7, %v110_v12 }
  0xb7   :  { %v235_v22 = vmul.f32 %v234_v8, %v149_v13  ;;  %v251_v23 = vmul.f32 %v250_v9, %v149_v13  ;;  %v267_v24 = vmul.f32 %v266_v10, %v149_v13  ;;  %v283_v25 = vmul.f32 %v282_v11, %v149_v13 }
  0xb9   :  { %v236_v30 = vadd.f32 %v235_v22, %v232_v18  ;;  %v252_v31 = vadd.f32 %v251_v23, %v248_v19  ;;  %v268_v32 = vadd.f32 %v267_v24, %v264_v20  ;;  %v284_v33 = vadd.f32 %v283_v25, %v280_v21  ;;  %v188_v34 = vpop.f32.mrf.mxu2  ;;  %v227_v35 = vpop.f32.mrf.mxu3 }
  0xba   :  { %v239_v36 = vmul.f32 %v238_v14, %v188_v34  ;;  %v255_v37 = vmul.f32 %v254_v15, %v188_v34  ;;  %v271_v38 = vmul.f32 %v270_v16, %v188_v34  ;;  %v287_v39 = vmul.f32 %v286_v17, %v188_v34 }
  0xbb   :  { %v243_v41 = vmul.f32 %v242_v26, %v227_v35  ;;  %v275_v42 = vmul.f32 %v274_v28, %v227_v35  ;;  %v259_v45 = vmul.f32 %v258_v27, %v227_v35  ;;  %v291_v46 = vmul.f32 %v290_v29, %v227_v35 }
  0xbc   :  { %v272_v43 = vadd.f32 %v271_v38, %v268_v32  ;;  %v240_v44 = vadd.f32 %v239_v36, %v236_v30  ;;  %v256_v49 = vadd.f32 %v255_v37, %v252_v31  ;;  %v288_v50 = vadd.f32 %v287_v39, %v284_v33 }
  0xbe   :  { %v594_v51 = vadd.f32 %v275_v42, %v272_v43  ;;  %v244_v52 = vadd.f32 %v243_v41, %v240_v44  ;;  %v599_v57 = vadd.f32 %v291_v46, %v288_v50  ;;  %v260_v58 = vadd.f32 %v259_v45, %v256_v49 }
  0xc0   :  { %v277_v53 = vmax.f32 %v594_v51, 0.0  ;;  %v245_v54 = vmax.f32 %v244_v52, 0.0  ;;  %v293_v59 = vmax.f32 %v599_v57, 0.0  ;;  %v261_v61 = vmax.f32 %v260_v58, 0.0 }
  0xc2   :  { %v304_v55 = vmul.f32 %v303_v47, %v277_v53  ;;  %v296_v56 = vmul.f32 %v295_v48, %v245_v54  ;;  %v308_v63 = vmul.f32 %v307_v60, %v293_v59  ;;  %v300_v0 = vmul.f32 %v299_v62, %v261_v61 }
  0xc4   :  { %305 = vadd.xlane.f32.xlu1 %v304_v55  ;;  %297 = vadd.xlane.f32.xlu0 %v296_v56 }
  0xcc   :  { %309 = vadd.xlane.f32.xlu1 %v308_v63  ;;  %301 = vadd.xlane.f32.xlu0 %v300_v0 }
 0x137   :  { %v298_v1 = vpop.xlane.xlu0 %297  ;;  %v306_v2 = vpop.xlane.xlu1 %305 }
 0x13f   :  { %v302_v3 = vpop.xlane.xlu0 %301  ;;  %v310_v6 = vpop.xlane.xlu1 %309 }
 0x140   :  { %v311_v4 = vmax.f32 %v298_v1, %v302_v3 }
 0x142   :  { %v312_v5 = vmax.f32 %v311_v4, %v306_v2 }
 0x144   :  { %v313_v7 = vmax.f32 %v312_v5, %v310_v6 }
 0x146   :  { %v314_v8 = vsub.f32 %v298_v1, %v313_v7  ;;  %v317_v9 = vsub.f32 %v302_v3, %v313_v7  ;;  %v320_v10 = vsub.f32 %v306_v2, %v313_v7  ;;  %v323_v11 = vsub.f32 %v310_v6, %v313_v7 }
 0x148   :  { %v315_v12 = vmul.f32 1.442695, %v314_v8  ;;  %v318_v13 = vmul.f32 1.442695, %v317_v9  ;;  %v321_v14 = vmul.f32 1.442695, %v320_v10 }
 0x149   :  { %v324_v15 = vmul.f32 1.442695, %v323_v11 }
 0x14a   :  { %397 = vpow2.f32 %v315_v12 }
 0x14b   :  { %399 = vpow2.f32 %v318_v13 }
 0x14c   :  { %401 = vpow2.f32 %v321_v14 }
 0x14d   :  { %403 = vpow2.f32 %v324_v15 }
 0x150   :  { %v398_v16 = vpop.eup %397 }
 0x151   :  { %v400_v17 = vpop.eup %399 }
 0x152   :  { %v326_v18 = vadd.f32 %v400_v17, %v398_v16  ;;  %v402_v19 = vpop.eup %401 }
 0x153   :  { %v404_v21 = vpop.eup %403 }
 0x154   :  { %v327_v20 = vadd.f32 %v402_v19, %v326_v18 }
 0x156   :  { %v328_v22 = vadd.f32 %v404_v21, %v327_v20 }
 0x158   :  { %405 = vrcp.f32 %v328_v22  ;;  %v340_v26 = vand.u32 2147483648, %v328_v22  ;;  %v338_v28 = vand.u32 2147483647, %v328_v22  ;;  %vm334_vm1 = vweird.f32 %v328_v22 }
 0x15a   :  { %v341_v30 = vor.u32 1.1754944e-38, %v340_v26  ;;  %vm339_vm3 = vcmp.eq.f32.partialorder %v338_v28, 8.507059e+37 }
 0x15e   :  { %v406_v23 = vpop.eup %405 }
 0x15f   :  { %v330_v24 = vmul.f32 %v406_v23, %v328_v22  ;;  %vm335_vm0 = vweird.f32 %v406_v23 }
 0x160   :  { %vm336_vm2 = vmor %vm334_vm1, %vm335_vm0 }
 0x161   :  { %v331_v25 = vsub.f32 1.0, %v330_v24 }
 0x163   :  { %v332_v27 = vmul.f32 %v406_v23, %v331_v25 }
 0x165   :  { %v333_v29 = vadd.f32 %v406_v23, %v332_v27 }
 0x167   :  { %v337_v31 = vsel %vm336_vm2, %v406_v23, %v333_v29 }
 0x168   :  { %v342_v32 = vsel %vm339_vm3, %v341_v30, %v337_v31 }
 0x169   :  { %v346_v33 = vmul.f32 %v400_v17, %v342_v32  ;;  %v344_v34 = vmul.f32 %v398_v16, %v342_v32  ;;  %v349_v35 = vmul.f32 %v402_v19, %v342_v32  ;;  %v352_v38 = vmul.f32 %v404_v21, %v342_v32 }
 0x16b   :  { %v345_v36 = vmul.f32 %v344_v34, %v245_v54  ;;  %v347_v37 = vmul.f32 %v346_v33, %v261_v61  ;;  %v350_v40 = vmul.f32 %v349_v35, %v277_v53  ;;  %v353_v42 = vmul.f32 %v352_v38, %v293_v59 }
 0x16d   :  { %v348_v39 = vadd.f32 %v347_v37, %v345_v36 }
 0x16f   :  { %v351_v41 = vadd.f32 %v350_v40, %v348_v39 }
 0x171   :  { %v354_v43 = vadd.f32 %v353_v42, %v351_v41 }
 0x173   :  { %355 = vst [vmem:[#allocation10] sm:$0xff] %v354_v43 }
 0x174   :  { %366 = dma.vmem_to_hbm [thread:$0]  %s362_s23, 128, %s364_s26, [#allocation4]  }
 0x175   :  { %521 = dma.done.wait [#allocation4], 128  }
 0x176   :  { %522 = vsyncadd [#allocation4], 4294967168 }
 0x177   :  { %371 = vsyncpa [#allocation3], 1 }
 0x178   :  { %372 = vsyncpa [#allocation7], 1 }
 0x179   :  { %373 = vsyncpa [#allocation4], 1 }
 0x17a   :  { %374 = vsyncpa [#allocation5], 1 }

</bundles_post_ra>
